<compile_context>
chip_gen: v7x
topology: tpu7x:2x2x1
jax: 0.10.0
libtpu: 0.0.40
codegen_flags: <defaults>
</compile_context>

<pallas_src>
import functools

import jax
import jax.numpy as jnp
from jax.experimental import pallas as pl
from jax.experimental.pallas import tpu as pltpu


def _adanorm_params_kernel(x_ref, w1t_hbm, w2t_hbm, wgbt_hbm, gb_ref,
                           acc_ref, w1t_v, w2t_v, wgbt_v, w_sem,
                           *, inv_hw, hw, tile):
    s = pl.program_id(1)  # spatial-tile index (reduction axis)

    def _w_copies():
        return (pltpu.make_async_copy(w1t_hbm, w1t_v, w_sem.at[0]),
                pltpu.make_async_copy(w2t_hbm, w2t_v, w_sem.at[1]),
                pltpu.make_async_copy(wgbt_hbm, wgbt_v, w_sem.at[2]))

    @pl.when(s == 0)
    def _init():
        acc_ref[...] = jnp.zeros_like(acc_ref)
        # Weights are only consumed on the last spatial step; kick off their
        # DMA now so it is hidden behind the x stream. Single VMEM copy (no
        # pipeline double-buffering of constant blocks).
        for cp in _w_copies():
            cp.start()

    # Partial spatial sum for this tile; accumulate in f32 even if x is bf16.
    x = x_ref[...].astype(jnp.float32)                       # (Bb, C, T)
    if hw % tile != 0:
        # Ragged last tile: lanes past the true H*W hold unspecified VMEM
        # contents. Select (not multiply) zeros so garbage/NaN is dropped.
        lane = jax.lax.broadcasted_iota(jnp.int32, x.shape, 2)
        x = jnp.where(lane < (hw - s * tile), x, 0.0)
    acc_ref[...] += jnp.sum(x, axis=-1)                      # (Bb, C)

    @pl.when(s == pl.num_programs(1) - 1)
    def _finalize():
        for cp in _w_copies():
            cp.wait()
        pooled = acc_ref[...] * inv_hw                       # mean over H*W
        # fc: Linear -> ReLU -> Linear -> ReLU (weights pre-transposed).
        h = jnp.maximum(
            jnp.dot(pooled, w1t_v[...], preferred_element_type=jnp.float32),
            0.0)
        h = jnp.maximum(
            jnp.dot(h, w2t_v[...], preferred_element_type=jnp.float32),
            0.0)
        # Fused gamma/beta head: (Bb, C) @ (C, 2C) -> (Bb, 2C).
        gb_ref[...] = jnp.dot(h, wgbt_v[...],
                              preferred_element_type=jnp.float32)


def adanorm_params_inference_net(x_nchw, w1, w2, wg, wb,
                                 *, max_tile_bytes=8 * 1024 * 1024):
    """x_nchw: (B, C, H, W) float32/bfloat16; weights: (C, C) float32 each.

    Returns (gamma, beta), each (B, C) float32.
    """
    B, C, H, W = x_nchw.shape
    HW = H * W
    x3 = x_nchw.reshape(B, C, HW)          # metadata-only reshape
    itemsize = jnp.dtype(x3.dtype).itemsize

    # ---- per-group batch rows (Bb) -----------------------------------------
    # Legal out-block constraint: second-to-last block dim must be a multiple
    # of 8 or the full dim, so candidate Bb are multiple-of-8 divisors of B
    # (or B itself). Splitting B feeds both v7x TensorCores via the "parallel"
    # leading grid axis and also keeps the minimal (Bb, C, 128) block inside
    # the VMEM budget for large B*C.
    lane_min = 128 if HW >= 128 else HW
    cands = [d for d in range(8, B, 8) if B % d == 0]
    fit = [d for d in cands if d * C * lane_min * itemsize <= max_tile_bytes]
    if fit:
        Bb = max(fit)
    elif cands:
        Bb = min(cands)   # still over budget; vmem_limit below is sized to it
    else:
        # TODO(synk): for extreme B*C where even 8 rows overflow the budget
        # (or B has no multiple-of-8 divisor), add a C-tiling grid axis
        # instead of growing the block.
        Bb = B
    num_bg = B // Bb

    # ---- spatial tile --------------------------------------------------------
    row_bytes = Bb * C * itemsize
    cap_lanes = max(lane_min, (max_tile_bytes // max(row_bytes, 1)) // 128 * 128)
    if HW <= cap_lanes:
        T, num_tiles = HW, 1               # full-dim block, no masking needed
    else:
        T = cap_lanes                      # multiple of 128; last tile masked
        num_tiles = pl.cdiv(HW, T)

    # ---- weights: pre-transpose / fuse once outside the kernel --------------
    w1t = w1.T.astype(jnp.float32)                               # (C, C)
    w2t = w2.T.astype(jnp.float32)                               # (C, C)
    wgbt = jnp.concatenate([wg.T, wb.T], axis=1).astype(jnp.float32)  # (C, 2C)

    # ---- explicit VMEM budget ------------------------------------------------
    tile_bytes = Bb * C * T * itemsize
    w_bytes = 4 * C * C * 4                      # w1t + w2t + wgbt, one copy
    out_bytes = Bb * 2 * C * 4
    acc_bytes = Bb * C * 4
    vmem_need = 2 * tile_bytes + w_bytes + 2 * out_bytes + acc_bytes
    vmem_limit = int(min(vmem_need + (8 << 20), 112 << 20))

    kernel = functools.partial(_adanorm_params_kernel,
                               inv_hw=1.0 / float(HW), hw=HW, tile=T)

    cost = pl.CostEstimate(
        flops=int(B * C * HW + 8 * B * C * C),
        transcendentals=0,
        bytes_accessed=int(B * C * HW * itemsize + 16 * C * C + 8 * B * C),
    )

    gamma_beta = pl.pallas_call(
        kernel,
        out_shape=jax.ShapeDtypeStruct((B, 2 * C), jnp.float32),
        grid_spec=pltpu.PrefetchScalarGridSpec(
            num_scalar_prefetch=0,
            grid=(num_bg, num_tiles),
            in_specs=[
                pl.BlockSpec((Bb, C, T), lambda bg, s: (bg, 0, s)),
                pl.BlockSpec(memory_space=pl.ANY),   # w1t  (HBM, manual DMA)
                pl.BlockSpec(memory_space=pl.ANY),   # w2t
                pl.BlockSpec(memory_space=pl.ANY),   # wgbt
            ],
            out_specs=pl.BlockSpec((Bb, 2 * C), lambda bg, s: (bg, 0)),
            scratch_shapes=[
                pltpu.VMEM((Bb, C), jnp.float32),        # pooled-sum acc
                pltpu.VMEM((C, C), jnp.float32),         # w1t
                pltpu.VMEM((C, C), jnp.float32),         # w2t
                pltpu.VMEM((C, 2 * C), jnp.float32),     # wgbt
                pltpu.SemaphoreType.DMA((3,)),
            ],
        ),
        compiler_params=pltpu.CompilerParams(
            dimension_semantics=("parallel", "arbitrary"),
            vmem_limit_bytes=vmem_limit,
        ),
        cost_estimate=cost,
    )(x3, w1t, w2t, wgbt)

    return gamma_beta[:, :C], gamma_beta[:, C:]


def init_params(key, features):
    """Deterministic init mimicking torch.nn.Linear default (U(-k, k), k=1/sqrt(in))."""
    k = 1.0 / jnp.sqrt(jnp.float32(features))
    keys = jax.random.split(key, 4)

    def mk(kk):
        return jax.random.uniform(kk, (features, features), jnp.float32,
                                  minval=-k, maxval=k)

    return mk(keys[0]), mk(keys[1]), mk(keys[2]), mk(keys[3])


def reference(x_nchw, w1, w2, wg, wb):
    """Plain-JAX reference for correctness check."""
    pooled = jnp.mean(x_nchw.astype(jnp.float32), axis=(2, 3))
    h = jnp.maximum(pooled @ w1.T, 0.0)
    h = jnp.maximum(h @ w2.T, 0.0)
    return h @ wg.T, h @ wb.T


if __name__ == "__main__":
    key = jax.random.PRNGKey(0)

    # --- primary check: shapes consistent with the module (ngf=8, mult=4 -> C=32)
    B, C, H, W = 2, 32, 16, 16
    kx, kp, kx2 = jax.random.split(key, 3)
    x = jax.random.normal(kx, (B, C, H, W), jnp.float32)
    w1, w2, wg, wb = init_params(kp, C)

    gamma, beta = adanorm_params_inference_net(x, w1, w2, wg, wb)
    gamma = jax.block_until_ready(gamma)
    beta = jax.block_until_ready(beta)

    g_ref, b_ref = reference(x, w1, w2, wg, wb)
    assert gamma.shape == (B, C) and beta.shape == (B, C)
    assert jnp.allclose(gamma, g_ref, atol=1e-5, rtol=1e-5)
    assert jnp.allclose(beta, b_ref, atol=1e-5, rtol=1e-5)

    # --- secondary check: exercises the batch-group split, multi-tile spatial
    # streaming and the in-kernel ragged-tail mask (17*17 = 289 lanes) with a
    # deliberately tiny tile budget.
    B2, H2, W2 = 16, 17, 17
    x2 = jax.random.normal(kx2, (B2, C, H2, W2), jnp.float32)
    g2, b2 = adanorm_params_inference_net(x2, w1, w2, wg, wb,
                                          max_tile_bytes=256 * 1024)
    g2 = jax.block_until_ready(g2)
    b2 = jax.block_until_ready(b2)
    g2_ref, b2_ref = reference(x2, w1, w2, wg, wb)
    assert jnp.allclose(g2, g2_ref, atol=1e-5, rtol=1e-5)
    assert jnp.allclose(b2, b2_ref, atol=1e-5, rtol=1e-5)

    print("KERNEL_OK")
</pallas_src>

<mosaic_0001>
module attributes {stable_mosaic.version = 11 : i64} {
  func.func @_adanorm_params_kernel(%arg0: i32, %arg1: i32, %arg2: memref<2x32x256xf32, #tpu.memory_space<vmem>>, %arg3: memref<32x32xf32, #tpu.memory_space<any>>, %arg4: memref<32x32xf32, #tpu.memory_space<any>>, %arg5: memref<32x64xf32, #tpu.memory_space<any>>, %arg6: memref<2x64xf32, #tpu.memory_space<vmem>>, %arg7: memref<2x32xf32, #tpu.memory_space<vmem>>, %arg8: memref<32x32xf32, #tpu.memory_space<vmem>>, %arg9: memref<32x32xf32, #tpu.memory_space<vmem>>, %arg10: memref<32x64xf32, #tpu.memory_space<vmem>>, %arg11: memref<3x!tpu.dma_semaphore, #tpu.memory_space<semaphore_mem>>) attributes {dimension_semantics = [#tpu.dimension_semantics<parallel>, #tpu.dimension_semantics<arbitrary>], iteration_bounds = array<i64: 1, 1>, scalar_prefetch = 0 : i64, scratch_operands = 5 : i64, tpu.core_type = #tpu.core_type<tc>, window_params = [{transform_indices = @transform_0, window_bounds = array<i64: 2, 32, 256>}, {}, {}, {}, {transform_indices = @transform_4, window_bounds = array<i64: 2, 64>}]} {
    %c0_i32 = arith.constant 0 : i32
    %0 = arith.cmpi eq, %arg1, %c0_i32 : i32
    %1 = arith.extui %0 : i1 to i32
    %c0_i32_0 = arith.constant 0 : i32
    %2 = arith.cmpi ne, %1, %c0_i32_0 : i32
    scf.if %2 {
      %cst_9 = arith.constant 0.000000e+00 : f32
      %11 = vector.broadcast %cst_9 : f32 to vector<2x32xf32>
      %c0_10 = arith.constant 0 : index
      %c0_11 = arith.constant 0 : index
      %12 = vector.load %arg7[%c0_10, %c0_11] : memref<2x32xf32, #tpu.memory_space<vmem>>, vector<2x32xf32>
      tpu.vector_store %arg7[%c0_10, %c0_11], %11 {strides = array<i32>} : memref<2x32xf32, #tpu.memory_space<vmem>>, vector<2x32xf32>,
      %c0_i32_12 = arith.constant 0 : i32
      %13 = tpu.memref_slice %arg11[%c0_i32_12] : memref<3x!tpu.dma_semaphore, #tpu.memory_space<semaphore_mem>> -> memref<1x!tpu.dma_semaphore, #tpu.memory_space<semaphore_mem>>
      %14 = tpu.memref_squeeze %13 : memref<1x!tpu.dma_semaphore, #tpu.memory_space<semaphore_mem>> -> memref<!tpu.dma_semaphore, #tpu.memory_space<semaphore_mem>>
      tpu.enqueue_dma source(%arg3 : memref<32x32xf32, #tpu.memory_space<any>>) target(%arg8 : memref<32x32xf32, #tpu.memory_space<vmem>>) target_semaphore(%14 : memref<!tpu.dma_semaphore, #tpu.memory_space<semaphore_mem>>)
      %c1_i32 = arith.constant 1 : i32
      %15 = tpu.memref_slice %arg11[%c1_i32] : memref<3x!tpu.dma_semaphore, #tpu.memory_space<semaphore_mem>> -> memref<1x!tpu.dma_semaphore, #tpu.memory_space<semaphore_mem>>
      %16 = tpu.memref_squeeze %15 : memref<1x!tpu.dma_semaphore, #tpu.memory_space<semaphore_mem>> -> memref<!tpu.dma_semaphore, #tpu.memory_space<semaphore_mem>>
      tpu.enqueue_dma source(%arg4 : memref<32x32xf32, #tpu.memory_space<any>>) target(%arg9 : memref<32x32xf32, #tpu.memory_space<vmem>>) target_semaphore(%16 : memref<!tpu.dma_semaphore, #tpu.memory_space<semaphore_mem>>)
      %c2_i32 = arith.constant 2 : i32
      %17 = tpu.memref_slice %arg11[%c2_i32] : memref<3x!tpu.dma_semaphore, #tpu.memory_space<semaphore_mem>> -> memref<1x!tpu.dma_semaphore, #tpu.memory_space<semaphore_mem>>
      %18 = tpu.memref_squeeze %17 : memref<1x!tpu.dma_semaphore, #tpu.memory_space<semaphore_mem>> -> memref<!tpu.dma_semaphore, #tpu.memory_space<semaphore_mem>>
      tpu.enqueue_dma source(%arg5 : memref<32x64xf32, #tpu.memory_space<any>>) target(%arg10 : memref<32x64xf32, #tpu.memory_space<vmem>>) target_semaphore(%18 : memref<!tpu.dma_semaphore, #tpu.memory_space<semaphore_mem>>)
    } else {
    }
    %c0 = arith.constant 0 : index
    %c0_1 = arith.constant 0 : index
    %c0_2 = arith.constant 0 : index
    %3 = vector.load %arg2[%c0, %c0_1, %c0_2] : memref<2x32x256xf32, #tpu.memory_space<vmem>>, vector<2x32x256xf32>
    %c0_3 = arith.constant 0 : index
    %c0_4 = arith.constant 0 : index
    %4 = vector.load %arg7[%c0_3, %c0_4] : memref<2x32xf32, #tpu.memory_space<vmem>>, vector<2x32xf32>
    %cst = arith.constant dense<0.000000e+00> : vector<2x32xf32>
    %5 = vector.multi_reduction <add>, %3, %cst [2] : vector<2x32x256xf32> to vector<2x32xf32>
    %6 = arith.addf %4, %5 : vector<2x32xf32>
    %c0_5 = arith.constant 0 : index
    %c0_6 = arith.constant 0 : index
    %7 = vector.load %arg7[%c0_5, %c0_6] : memref<2x32xf32, #tpu.memory_space<vmem>>, vector<2x32xf32>
    tpu.vector_store %arg7[%c0_5, %c0_6], %6 {strides = array<i32>} : memref<2x32xf32, #tpu.memory_space<vmem>>, vector<2x32xf32>,
    %c0_i32_7 = arith.constant 0 : i32
    %8 = arith.cmpi eq, %arg1, %c0_i32_7 : i32
    %9 = arith.extui %8 : i1 to i32
    %c0_i32_8 = arith.constant 0 : i32
    %10 = arith.cmpi ne, %9, %c0_i32_8 : i32
    scf.if %10 {
      %c0_i32_9 = arith.constant 0 : i32
      %11 = tpu.memref_slice %arg11[%c0_i32_9] : memref<3x!tpu.dma_semaphore, #tpu.memory_space<semaphore_mem>> -> memref<1x!tpu.dma_semaphore, #tpu.memory_space<semaphore_mem>>
      %12 = tpu.memref_squeeze %11 : memref<1x!tpu.dma_semaphore, #tpu.memory_space<semaphore_mem>> -> memref<!tpu.dma_semaphore, #tpu.memory_space<semaphore_mem>>
      tpu.wait_dma2 semaphore(%12 : memref<!tpu.dma_semaphore, #tpu.memory_space<semaphore_mem>>) src(%arg3 : memref<32x32xf32, #tpu.memory_space<any>>) dst(%arg8 : memref<32x32xf32, #tpu.memory_space<vmem>>)
      %c1_i32 = arith.constant 1 : i32
      %13 = tpu.memref_slice %arg11[%c1_i32] : memref<3x!tpu.dma_semaphore, #tpu.memory_space<semaphore_mem>> -> memref<1x!tpu.dma_semaphore, #tpu.memory_space<semaphore_mem>>
      %14 = tpu.memref_squeeze %13 : memref<1x!tpu.dma_semaphore, #tpu.memory_space<semaphore_mem>> -> memref<!tpu.dma_semaphore, #tpu.memory_space<semaphore_mem>>
      tpu.wait_dma2 semaphore(%14 : memref<!tpu.dma_semaphore, #tpu.memory_space<semaphore_mem>>) src(%arg4 : memref<32x32xf32, #tpu.memory_space<any>>) dst(%arg9 : memref<32x32xf32, #tpu.memory_space<vmem>>)
      %c2_i32 = arith.constant 2 : i32
      %15 = tpu.memref_slice %arg11[%c2_i32] : memref<3x!tpu.dma_semaphore, #tpu.memory_space<semaphore_mem>> -> memref<1x!tpu.dma_semaphore, #tpu.memory_space<semaphore_mem>>
      %16 = tpu.memref_squeeze %15 : memref<1x!tpu.dma_semaphore, #tpu.memory_space<semaphore_mem>> -> memref<!tpu.dma_semaphore, #tpu.memory_space<semaphore_mem>>
      tpu.wait_dma2 semaphore(%16 : memref<!tpu.dma_semaphore, #tpu.memory_space<semaphore_mem>>) src(%arg5 : memref<32x64xf32, #tpu.memory_space<any>>) dst(%arg10 : memref<32x64xf32, #tpu.memory_space<vmem>>)
      %c0_10 = arith.constant 0 : index
      %c0_11 = arith.constant 0 : index
      %17 = vector.load %arg7[%c0_10, %c0_11] : memref<2x32xf32, #tpu.memory_space<vmem>>, vector<2x32xf32>
      %cst_12 = arith.constant 3.906250e-03 : f32
      %18 = vector.broadcast %cst_12 : f32 to vector<2x32xf32>
      %19 = arith.mulf %17, %18 : vector<2x32xf32>
      %c0_13 = arith.constant 0 : index
      %c0_14 = arith.constant 0 : index
      %20 = vector.load %arg8[%c0_13, %c0_14] : memref<32x32xf32, #tpu.memory_space<vmem>>, vector<32x32xf32>
      %cst_15 = arith.constant dense<0.000000e+00> : vector<2x32xf32>
      %21 = tpu.matmul %19, %20, %cst_15 {dimension_numbers = #tpu.dot_dimension_numbers<[1], [0], [0], [1], [0, 0, 1, 1], [], []>} : vector<2x32xf32>, vector<32x32xf32>, vector<2x32xf32> -> vector<2x32xf32>
      %cst_16 = arith.constant 0.000000e+00 : f32
      %22 = vector.broadcast %cst_16 : f32 to vector<2x32xf32>
      %23 = arith.maximumf %21, %22 : vector<2x32xf32>
      %c0_17 = arith.constant 0 : index
      %c0_18 = arith.constant 0 : index
      %24 = vector.load %arg9[%c0_17, %c0_18] : memref<32x32xf32, #tpu.memory_space<vmem>>, vector<32x32xf32>
      %cst_19 = arith.constant dense<0.000000e+00> : vector<2x32xf32>
      %25 = tpu.matmul %23, %24, %cst_19 {dimension_numbers = #tpu.dot_dimension_numbers<[1], [0], [0], [1], [0, 0, 1, 1], [], []>} : vector<2x32xf32>, vector<32x32xf32>, vector<2x32xf32> -> vector<2x32xf32>
      %cst_20 = arith.constant 0.000000e+00 : f32
      %26 = vector.broadcast %cst_20 : f32 to vector<2x32xf32>
      %27 = arith.maximumf %25, %26 : vector<2x32xf32>
      %c0_21 = arith.constant 0 : index
      %c0_22 = arith.constant 0 : index
      %28 = vector.load %arg10[%c0_21, %c0_22] : memref<32x64xf32, #tpu.memory_space<vmem>>, vector<32x64xf32>
      %cst_23 = arith.constant dense<0.000000e+00> : vector<2x64xf32>
      %29 = tpu.matmul %27, %28, %cst_23 {dimension_numbers = #tpu.dot_dimension_numbers<[1], [0], [0], [1], [0, 0, 1, 1], [], []>} : vector<2x32xf32>, vector<32x64xf32>, vector<2x64xf32> -> vector<2x64xf32>
      %c0_24 = arith.constant 0 : index
      %c0_25 = arith.constant 0 : index
      %30 = vector.load %arg6[%c0_24, %c0_25] : memref<2x64xf32, #tpu.memory_space<vmem>>, vector<2x64xf32>
      tpu.vector_store %arg6[%c0_24, %c0_25], %29 {strides = array<i32>} : memref<2x64xf32, #tpu.memory_space<vmem>>, vector<2x64xf32>,
    } else {
    }
    return
  }
  func.func @transform_0(%arg0: i32, %arg1: i32) -> (i32, i32, i32) {
    %c0_i32 = arith.constant 0 : i32
    %c0_i32_0 = arith.constant 0 : i32
    return %arg0, %c0_i32, %arg1 : i32, i32, i32
  }
  func.func @transform_4(%arg0: i32, %arg1: i32) -> (i32, i32) {
    %c0_i32 = arith.constant 0 : i32
    %c0_i32_0 = arith.constant 0 : i32
    return %arg0, %c0_i32 : i32, i32
  }
}

</mosaic_0001>

<bundles_post_ra>
// kernel: tpu_custom_call.1
= control target key start
LH: loop header
LB: loop body
LE: loop exit
PB: predicated region body
PF: predicated region fallthrough
CT: control target
= control target key end

     0   :  { %9 = vsyncpa [#allocation8], 0  ;;  %s762_s0 = inlined_call_operand.hbm [shape: f32[2,32,256], index: 0, kind: input, shape index: {}]   ;;  %s763_s1 = inlined_call_operand.hbm [shape: f32[32,32], index: 1, kind: input, shape index: {}]   ;;  %s764_s2 = inlined_call_operand.hbm [shape: f32[32,32], index: 2, kind: input, shape index: {}]   ;;  %s765_s3 = inlined_call_operand.hbm [shape: f32[32,64], index: 3, kind: input, shape index: {}]   ;;  %s766_s4 = inlined_call_operand.hbm [shape: f32[2,64], index: 4, kind: output, shape index: {}]  }
   0x1   :  { %10 = vsyncpa [#allocation9], 0  ;;  %s655_s15 = smov [#allocation7]   ;;  %s535_s19 = scalar_lea.hbm %s762_s0, 2048 }
   0x2   :  { %s16_s16 = sshll.u32 %s655_s15, 4  ;;  %p536_p0 = scmp.ne.s32.totalorder %s762_s0, %s535_s19  ;;  %s17_s16 = int_to_ptr.vmem [resolvable:$true] %s16_s16 }
   0x3   :  { %p539_p1 = scmp.lt.u32.totalorder %s535_s19, %s762_s0 }
   0x5   :  { %p541_p2 = pnand %p539_p1, %p536_p0 }
   0x7   :  { %544 = shalt.err (!%p541_p2)
}
   0x8   :  { %s545_s24 = scalar_lea.vmem %s17_s16, 2048  ;;  %p550_p4 = scmp.lt.s32.totalorder %s17_s16, %s17_s16 }
   0x9   :  { %p546_p3 = scmp.ne.s32.totalorder %s17_s16, %s545_s24  ;;  %p551_p5 = scmp.lt.s32.totalorder %s545_s24, %s545_s24 }
   0xb   :  { %p552_p6 = por %p551_p5, %p550_p4 }
   0xd   :  { %p553_p7 = pnand %p552_p6, %p546_p3 }
   0xf   :  { %556 = shalt.err (!%p553_p7)
}
  0x10   :  { %s656_s25 = smov 256   ;;  %s657_s26 = smov 16  }
  0x11   :  { %22 = dma.hbm_to_vmem [thread:$0]  %s762_s0, 2048, %s17_s16, [#allocation8], %s656_s25, %s656_s25, %s657_s26  }
  0x12   :  { %645 = dma.done.wait [#allocation8], 2048  }
  0x13   :  { %646 = vsyncadd [#allocation8], 4294965248  ;;  %v75_v0 = vld [vmem:[#allocation7 + $0x40] sm:$0xff]  ;;  %v76_v1 = vld [vmem:[#allocation7 + $0x48] sm:$0xff]  ;;  %vm30_vm0 = vcmask 254976   ;;  %v658_v24 = vmov 0.0  }
  0x14   :  { %v67_v2 = vld [vmem:[#allocation7] sm:$0xff]  ;;  %v96_v3 = vadd.f32 %v76_v1, %v75_v0  ;;  %v68_v4 = vld [vmem:[#allocation7 + $0x8] sm:$0xff]  ;;  %v77_v5 = vld [vmem:[#allocation7 + $0x50] sm:$0xff]  ;;  %31 = vst.msk [vmem:[#allocation2] sm:$0x3] %vm30_vm0, %v658_v24  ;;  %s659_s0 = smov [#allocation3]  }
  0x15   :  { %v78_v6 = vld [vmem:[#allocation7 + $0x58] sm:$0xff]  ;;  %v84_v7 = vadd.f32 %v68_v4, %v67_v2  ;;  %v69_v8 = vld [vmem:[#allocation7 + $0x10] sm:$0xff]  ;;  %v79_v12 = vld [vmem:[#allocation7 + $0x60] sm:$0xff]  ;;  %s39_s29 = sshll.u32 %s659_s0, 4  ;;  %s660_s30 = smov [#allocation4]   ;;  %s40_s29 = int_to_ptr.vmem [resolvable:$true] %s39_s29 }
  0x16   :  { %v70_v9 = vld [vmem:[#allocation7 + $0x18] sm:$0xff]  ;;  %97 = vadd.xlane.f32.xlu1 %v96_v3  ;;  %v99_v10 = vadd.f32 %v78_v6, %v77_v5  ;;  %v80_v13 = vld [vmem:[#allocation7 + $0x68] sm:$0xff]  ;;  %v71_v14 = vld [vmem:[#allocation7 + $0x20] sm:$0xff]  ;;  %s51_s5 = sshll.u32 %s660_s30, 4  ;;  %s557_s8 = scalar_lea.hbm %s763_s1, 512  ;;  %s52_s5 = int_to_ptr.vmem [resolvable:$true] %s51_s5 }
  0x17   :  { %85 = vadd.xlane.f32.xlu0 %v84_v7  ;;  %v87_v11 = vadd.f32 %v70_v9, %v69_v8  ;;  %v72_v15 = vld [vmem:[#allocation7 + $0x28] sm:$0xff]  ;;  %v102_v16 = vadd.f32 %v80_v13, %v79_v12  ;;  %v81_v18 = vld [vmem:[#allocation7 + $0x70] sm:$0xff]  ;;  %v82_v19 = vld [vmem:[#allocation7 + $0x78] sm:$0xff]  ;;  %p558_p8 = scmp.ne.s32.totalorder %s763_s1, %s557_s8  ;;  %p561_p9 = scmp.lt.u32.totalorder %s557_s8, %s763_s1 }
  0x18   :  { %v90_v17 = vadd.f32 %v72_v15, %v71_v14  ;;  %v73_v20 = vld [vmem:[#allocation7 + $0x30] sm:$0xff]  ;;  %v74_v21 = vld [vmem:[#allocation7 + $0x38] sm:$0xff]  ;;  %v105_v22 = vadd.f32 %v82_v19, %v81_v18 }
  0x19   :  { %v93_v23 = vadd.f32 %v74_v21, %v73_v20  ;;  %p563_p10 = pnand %p561_p9, %p558_p8 }
  0x1a   :  { %100 = vadd.xlane.f32.xlu1 %v99_v10 }
  0x1b   :  { %88 = vadd.xlane.f32.xlu0 %v87_v11 }
  0x1e   :  { %103 = vadd.xlane.f32.xlu1 %v102_v16 }
  0x1f   :  { %91 = vadd.xlane.f32.xlu0 %v90_v17 }
  0x22   :  { %106 = vadd.xlane.f32.xlu1 %v105_v22 }
  0x23   :  { %94 = vadd.xlane.f32.xlu0 %v93_v23 }
  0x24   :  { %566 = shalt.err (!%p563_p10)  }
  0x25   :  { %s567_s13 = scalar_lea.vmem %s40_s29, 512  ;;  %p572_p12 = scmp.lt.s32.totalorder %s40_s29, %s40_s29 }
  0x26   :  { %p568_p11 = scmp.ne.s32.totalorder %s40_s29, %s567_s13  ;;  %p573_p13 = scmp.lt.s32.totalorder %s567_s13, %s567_s13 }
  0x28   :  { %p574_p0 = por %p573_p13, %p572_p12 }
  0x2a   :  { %p575_p1 = pnand %p574_p0, %p568_p11 }
  0x2c   :  { %578 = shalt.err (!%p575_p1)  }
  0x2d   :  { %42 = dma.hbm_to_vmem [thread:$0]  %s763_s1, 512, %s40_s29, [#allocation6] }
  0x2e   :  { %s579_s18 = scalar_lea.hbm %s764_s2, 512 }
  0x2f   :  { %p580_p2 = scmp.ne.s32.totalorder %s764_s2, %s579_s18  ;;  %p583_p3 = scmp.lt.u32.totalorder %s579_s18, %s764_s2 }
  0x31   :  { %p585_p4 = pnand %p583_p3, %p580_p2 }
  0x33   :  { %588 = shalt.err (!%p585_p4)  }
  0x34   :  { %s589_s23 = scalar_lea.vmem %s52_s5, 512  ;;  %p594_p6 = scmp.lt.s32.totalorder %s52_s5, %s52_s5 }
  0x35   :  { %p590_p5 = scmp.ne.s32.totalorder %s52_s5, %s589_s23  ;;  %p595_p7 = scmp.lt.s32.totalorder %s589_s23, %s589_s23 }
  0x37   :  { %p596_p8 = por %p595_p7, %p594_p6 }
  0x39   :  { %p597_p9 = pnand %p596_p8, %p590_p5 }
  0x3b   :  { %600 = shalt.err (!%p597_p9)  }
  0x3c   :  { %54 = dma.hbm_to_vmem [thread:$0]  %s764_s2, 512, %s52_s5, [#allocation6 + $0x1] }
  0x3d   :  { %s661_s25 = smov [#allocation5]   ;;  %s601_s0 = scalar_lea.hbm %s765_s3, 512 }
  0x3e   :  { %s63_s26 = sshll.u32 %s661_s25, 4  ;;  %p602_p10 = scmp.ne.s32.totalorder %s765_s3, %s601_s0  ;;  %s64_s26 = int_to_ptr.vmem [resolvable:$true] %s63_s26 }
  0x3f   :  { %p605_p11 = scmp.lt.u32.totalorder %s601_s0, %s765_s3 }
  0x41   :  { %p607_p12 = pnand %p605_p11, %p602_p10 }
  0x43   :  { %610 = shalt.err (!%p607_p12)  }
  0x44   :  { %s611_s8 = scalar_lea.vmem %s64_s26, 512  ;;  %p616_p0 = scmp.lt.s32.totalorder %s64_s26, %s64_s26 }
  0x45   :  { %p612_p13 = scmp.ne.s32.totalorder %s64_s26, %s611_s8  ;;  %p617_p1 = scmp.lt.s32.totalorder %s611_s8, %s611_s8 }
  0x47   :  { %p618_p2 = por %p617_p1, %p616_p0 }
  0x49   :  { %p619_p3 = pnand %p618_p2, %p612_p13 }
  0x4b   :  { %622 = shalt.err (!%p619_p3)  }
  0x4c   :  { %66 = dma.hbm_to_vmem [thread:$0]  %s765_s3, 512, %s64_s26, [#allocation6 + $0x2]  ;;  %v116_v25 = vlaneseq  ;;  %vm127_vm1 = vcmask 130112   ;;  %vm134_vm2 = vcmask 195712   ;;  %vm141_vm3 = vcmask 261312  }
  0x4d   :  { %vm162_vm4 = vcmask 1041409   ;;  %v83_v56 = vld [vmem:[#allocation2] sm:$0x3] }
  0x4e   :  { %v117_v26 = vand.u32 127, %v116_v25  ;;  %v119_v31 = vshrl.u32 %v116_v25, 7 }
  0x50   :  { %v122_v29 = vadd.s32 4294967288, %v117_v26  ;;  %v129_v30 = vadd.s32 4294967280, %v117_v26  ;;  %v136_v35 = vadd.s32 4294967272, %v117_v26  ;;  %v120_v37 = vsub.s32 %v117_v26, %v119_v31 }
  0x52   :  { %v125_v33 = vsub.s32 %v122_v29, %v119_v31  ;;  %v132_v36 = vsub.s32 %v129_v30, %v119_v31  ;;  %v139_v41 = vsub.s32 %v136_v35, %v119_v31 }
  0xa3   :  { %v98_v27 = vpop.xlane.xlu1 %97 }
  0xa4   :  { %v86_v28 = vpop.xlane.xlu0 %85  ;;  %v146_v44 = vrot.slane %v98_v27, %v120_v37 }
  0xa5   :  { %v121_v46 = vrot.slane %v86_v28, %v120_v37 }
  0xa7   :  { %v101_v32 = vpop.xlane.xlu1 %100 }
  0xa8   :  { %v89_v34 = vpop.xlane.xlu0 %88  ;;  %v150_v39 = vrot.slane %v101_v32, %v125_v33 }
  0xa9   :  { %v126_v42 = vrot.slane %v89_v34, %v125_v33 }
  0xaa   :  { %v151_v48 = vsel %vm127_vm1, %v150_v39, %v146_v44 }
  0xab   :  { %v104_v38 = vpop.xlane.xlu1 %103  ;;  %v128_v51 = vsel %vm127_vm1, %v126_v42, %v121_v46 }
  0xac   :  { %v92_v40 = vpop.xlane.xlu0 %91  ;;  %v155_v43 = vrot.slane %v104_v38, %v132_v36 }
  0xad   :  { %v133_v45 = vrot.slane %v92_v40, %v132_v36 }
  0xae   :  { %v156_v52 = vsel %vm134_vm2, %v155_v43, %v151_v48 }
  0xaf   :  { %v107_v47 = vpop.xlane.xlu1 %106  ;;  %v135_v54 = vsel %vm134_vm2, %v133_v45, %v128_v51 }
  0xb0   :  { %v160_v49 = vrot.slane %v107_v47, %v139_v41  ;;  %v95_v50 = vpop.xlane.xlu0 %94 }
  0xb1   :  { %v140_v53 = vrot.slane %v95_v50, %v139_v41 }
  0xb2   :  { %v161_v55 = vsel %vm141_vm3, %v160_v49, %v156_v52 }
  0xb3   :  { %v142_v57 = vsel %vm141_vm3, %v140_v53, %v135_v54 }
  0xb4   :  { %v163_v58 = vsel %vm162_vm4, %v161_v55, %v142_v57 }
  0xb5   :  { %v165_v59 = vadd.f32 %v163_v58, %v83_v56 }
  0xb7   :  { %167 = vst.msk [vmem:[#allocation2] sm:$0x3] %vm30_vm0, %v165_v59 }
  0xb8   :  { %647 = dma.done.wait [#allocation6], 512 }
  0xb9   :  { %648 = vsyncadd [#allocation6], 4294966784 }
  0xba   :  { %649 = dma.done.wait [#allocation6 + $0x1], 512 }
  0xbb   :  { %650 = vsyncadd [#allocation6 + $0x1], 4294966784 }
  0xbc   :  { %651 = dma.done.wait [#allocation6 + $0x2], 512 }
  0xbd   :  { %652 = vsyncadd [#allocation6 + $0x2], 4294966784  ;;  %v662_v60 = vmov 0.0|0.0   ;;  %vm663_vm5 = vmmov 0   ;;  %v182_v61 = vld [vmem:[#allocation3] sm:$0xff]  ;;  %v183_v62 = vld [vmem:[#allocation3 + $0x8] sm:$0xff] }
  0xbe   :  { %507 = vmatprep.subr.bf16.mxu0 %v662_v60  ;;  %482 = vmatprep.mubr.msk.f32.mxu0 %vm663_vm5, %v658_v24  ;;  %v184_v63 = vld [vmem:[#allocation3 + $0x10] sm:$0xff]  ;;  %v508_v0 = vpack.c.bf16 %v183_v62, %v182_v61  ;;  %v185_v1 = vld [vmem:[#allocation3 + $0x18] sm:$0xff]  ;;  %v261_v2 = vld [vmem:[#allocation4] sm:$0xff]  ;;  %vm186_vm6 = vcmask 261120   ;;  %s664_s3 = smov [#allocation10]   ;;  %vm416_vm7 = vcmask 517120  }
  0xbf   :  { %513 = vmatprep.subr.bf16.mxu1 %v662_v60  ;;  %493 = vmatprep.mubr.msk.f32.mxu1 %vm663_vm5, %v658_v24  ;;  %v262_v3 = vld [vmem:[#allocation4 + $0x8] sm:$0xff]  ;;  %v511_v4 = vpack.c.bf16 %v185_v1, %v184_v63  ;;  %v180_v5 = vld [vmem:[#allocation2] sm:$0x3]  ;;  %v263_v8 = vld [vmem:[#allocation4 + $0x10] sm:$0xff]  ;;  %s424_s9 = sshll.u32 %s664_s3, 4  ;;  %s425_s9 = int_to_ptr.vmem [resolvable:$true] %s424_s9 }
  0xc0   :  { %509 = vmatpush3.bf16.msra.mxu0 %v508_v0  ;;  %v514_v6 = vpack.c.bf16 %v262_v3, %v261_v2  ;;  %v181_v7 = vmul.f32 0.00390625, %v180_v5  ;;  %v264_v9 = vld [vmem:[#allocation4 + $0x18] sm:$0xff]  ;;  %v339_v11 = vld [vmem:[#allocation5] sm:$0xff]  ;;  %v340_v12 = vld [vmem:[#allocation5 + $0x8] sm:$0xff]  ;;  %s623_s10 = scalar_lea.vmem %s425_s9, 32  ;;  %p628_p5 = scmp.lt.s32.totalorder %s425_s9, %s425_s9 }
  0xc1   :  { %510 = vmatprep.subr.bf16.mxu0 %v662_v60  ;;  %v517_v10 = vpack.c.bf16 %v264_v9, %v263_v8  ;;  %v520_v13 = vpack.c.bf16 %v340_v12, %v339_v11  ;;  %v341_v17 = vld [vmem:[#allocation5 + $0x10] sm:$0xff]  ;;  %v342_v18 = vld [vmem:[#allocation5 + $0x18] sm:$0xff]  ;;  %p624_p4 = scmp.ne.s32.totalorder %s425_s9, %s623_s10  ;;  %p629_p6 = scmp.lt.s32.totalorder %s623_s10, %s623_s10 }
  0xc2   :  { %515 = vmatpush3.bf16.msra.mxu1 %v514_v6  ;;  %v523_v19 = vpack.c.bf16 %v342_v18, %v341_v17 }
  0xc3   :  { %516 = vmatprep.subr.bf16.mxu1 %v662_v60  ;;  %p630_p7 = por %p629_p6, %p628_p5 }
  0xc4   :  { %512 = vmatpush3.bf16.msra.mxu0 %v511_v4 }
  0xc5   :  { %519 = vmatprep.subr.bf16.mxu0 %v662_v60  ;;  %p631_p8 = pnand %p630_p7, %p624_p4 }
  0xc6   :  { %518 = vmatpush3.bf16.msra.mxu1 %v517_v10 }
  0xc7   :  { %483 = vmatmul.mubr.msk.f32.vlgmr.msra.gmra.mrb[0].mxu0 %vm186_vm6, %v181_v7 }
  0xc8   :  { %504 = vmatprep.mubr.msk.f32.mxu0 %vm663_vm5, %v658_v24  ;;  %521 = vmatpush3.bf16.msra.mxu0 %v520_v13 }
  0xc9   :  { %522 = vmatprep.subr.bf16.mxu0 %v662_v60 }
  0xcc   :  { %524 = vmatpush3.bf16.msra.mxu0 %v523_v19 }
 0x19a   :  { %v256_v14 = vpop.f32.mrb[0].mxu0 }
 0x19b   :  { %v260_v15 = vmax.f32 %v256_v14, 0.0  ;;  %v484_v16 = vpop.f32.mrb[1].mxu0 }
 0x19d   :  { %494 = vmatmul.mubr.msk.f32.vlgmr.msra.gmra.mrb[0].mxu1 %vm186_vm6, %v260_v15 }
 0x270   :  { %v334_v20 = vpop.f32.mrb[0].mxu1 }
 0x271   :  { %v338_v21 = vmax.f32 %v334_v20, 0.0  ;;  %v495_v22 = vpop.f32.mrb[1].mxu1 }
 0x273   :  { %505 = vmatmul.mubr.msk.f32.vlgmr.msra.gmra.mrb[2].mxu0 %vm186_vm6, %v338_v21 }
 0x346   :  { %v412_v23 = vpop.f32.mrb[2].mxu0 }
 0x347   :  { %v506_v24 = vpop.f32.mrb[3].mxu0  ;;  %417 = vst.msk [vmem:[#allocation10] sm:$0x3] %vm416_vm7, %v412_v23 }
 0x348   :  { %634 = shalt.err (!%p631_p8)
}
 0x349   :  { %s635_s13 = scalar_lea.hbm %s766_s4, 32 }
 0x34a   :  { %p636_p9 = scmp.ne.s32.totalorder %s766_s4, %s635_s13  ;;  %p639_p10 = scmp.lt.u32.totalorder %s635_s13, %s766_s4 }
 0x34c   :  { %p641_p11 = pnand %p639_p10, %p636_p9 }
 0x34e   :  { %644 = shalt.err (!%p641_p11)
}
 0x34f   :  { %427 = dma.vmem_to_hbm [thread:$0]  %s425_s9, 32, %s766_s4, [#allocation9]  }
 0x350   :  { %653 = dma.done.wait [#allocation9], 32  }
 0x351   :  { %654 = vsyncadd [#allocation9], 4294967264 }
 0x352   :  { %431 = vsyncpa [#allocation8], 1 }
 0x353   :  { %432 = vsyncpa [#allocation9], 1 }
 0x354   :  { %433 = vsyncmov [#allocation6] }
 0x357   :  { %s434_s20 = vpop.sfrf %433 }
 0x358   :  { %p456_p12 = scmp.ne.s32.totalorder %s434_s20, 0 }
 0x35a   :  { %438 = shalt.err (%p456_p12)  }
 0x35b   :  { %440 = vsyncmov [#allocation6 + $0x1] }
 0x35e   :  { %s441_s21 = vpop.sfrf %440 }
 0x35f   :  { %p457_p13 = scmp.ne.s32.totalorder %s441_s21, 0 }
 0x361   :  { %445 = shalt.err (%p457_p13)  }
 0x362   :  { %447 = vsyncmov [#allocation6 + $0x2] }
 0x365   :  { %s448_s22 = vpop.sfrf %447 }
 0x366   :  { %p458_p0 = scmp.ne.s32.totalorder %s448_s22, 0 }
 0x368   :  { %452 = shalt.err (%p458_p0)  }

</bundles_post_ra>
